<compile_context>
chip_gen: v6e
topology: v6e:2x2x1
jax: 0.10.0
libtpu: 0.0.40
codegen_flags: <defaults>
</compile_context>

<pallas_src>
import functools

import jax
import jax.numpy as jnp
from jax.experimental import pallas as pl
from jax.experimental.pallas import tpu as pltpu

_LANE = 128            # lane granularity (last dim of any block)
_SUB = 16              # sublane granularity for bf16 blocks
_CAP_MN = 512          # max M / N tile (fits every gen's default scoped VMEM)
_CAP_K_SINGLE = 1024   # K small enough to keep resident as one reduction step


def _round_up(x, m):
    return ((x + m - 1) // m) * m


def _pick_block(dim, cap, gran):
    """Return (block, padded_dim); block == padded_dim when it fits under cap."""
    if dim <= cap:
        b = _round_up(dim, gran)
        return b, b
    return cap, _round_up(dim, cap)


def _pick_k_block(dim):
    """Reduction (K) block: single resident block when small, else the
    lane-aligned candidate that minimises padding (prefer larger)."""
    kp_full = _round_up(dim, _LANE)
    if kp_full <= _CAP_K_SINGLE:
        return kp_full, kp_full
    best_tk, best_kp = None, None
    for tk in (512, 384, 256, 128):
        kp = _round_up(dim, tk)
        if best_kp is None or kp < best_kp:
            best_tk, best_kp = tk, kp
    return best_tk, best_kp


def _split_for_megacore(tm, tn, Mp, Np):
    """Keep the parallel (i, j) grid >= 2 blocks so v7x's 2 TensorCores both
    get work (near-free on single-TC v5e/v6e)."""
    if Mp // tm == 1 and Np // tn == 1:
        if Np % 256 == 0:
            tn = Np // 2
        elif Mp % (2 * _SUB) == 0 and Mp > _SUB:
            tm = Mp // 2
    return tm, tn


def _apply_act(y, act):
    if act == "relu":
        return jnp.maximum(y, 0.0)
    if act == "gelu":
        # tanh-form GELU: jnp.tanh maps to the EUP (idle during the MXU k-loop).
        # Max abs deviation from nn.GELU()'s exact erf form is ~1e-3, below the
        # bf16 activation noise already accepted for the MXU inputs.
        c0 = 0.7978845608028654  # sqrt(2/pi)
        return 0.5 * y * (1.0 + jnp.tanh(c0 * (y + 0.044715 * y * y * y)))
    if act == "sigmoid":
        # EUP exp + approximate hardware reciprocal (free slot); clamp so the
        # result stays <= 1.0 despite the approximation.
        return jnp.minimum(pl.reciprocal(1.0 + jnp.exp(-y), approx=True), 1.0)
    return y


# --------------------------------------------------------------------------- #
# Pallas kernels
# --------------------------------------------------------------------------- #
@functools.lru_cache(maxsize=None)
def _build_conv_matmul(Mp, Kp, Np, tm, tn, tk, act, res_mode, out_dtype_name):
    """Tiled bf16 matmul (im2col conv) with fused scale/bias + act + residual."""
    out_dtype = jnp.dtype(out_dtype_name)
    has_res = res_mode is not None

    def kernel(a_ref, b_ref, s_ref, bias_ref, *rest):
        if has_res:
            r_ref, o_ref, acc_ref = rest
        else:
            o_ref, acc_ref = rest

        @pl.when(pl.program_id(2) == 0)
        def _():
            acc_ref[...] = jnp.zeros_like(acc_ref)

        # bf16 x bf16 -> f32 accumulation on the MXU.
        acc_ref[...] += jnp.dot(a_ref[...], b_ref[...],
                                preferred_element_type=jnp.float32)

        @pl.when(pl.program_id(2) == pl.num_programs(2) - 1)
        def _():
            y = acc_ref[...] * s_ref[...] + bias_ref[...]          # f32 epilogue
            if res_mode == "pre_act":       # bottleneck: add identity, then relu
                y = y + r_ref[...].astype(jnp.float32)
            y = _apply_act(y, act)
            if res_mode == "post_act":      # decoder: gelu, then add skip
                y = y + r_ref[...].astype(jnp.float32)
            o_ref[...] = y.astype(o_ref.dtype)

    in_specs = [
        pl.BlockSpec((tm, tk), lambda i, j, k: (i, k)),
        pl.BlockSpec((tk, tn), lambda i, j, k: (k, j)),
        pl.BlockSpec((1, tn), lambda i, j, k: (0, j)),
        pl.BlockSpec((1, tn), lambda i, j, k: (0, j)),
    ]
    if has_res:
        in_specs.append(pl.BlockSpec((tm, tn), lambda i, j, k: (i, j)))

    return pl.pallas_call(
        kernel,
        out_shape=jax.ShapeDtypeStruct((Mp, Np), out_dtype),
        grid_spec=pltpu.PrefetchScalarGridSpec(
            num_scalar_prefetch=0,
            grid=(Mp // tm, Np // tn, Kp // tk),
            in_specs=in_specs,
            out_specs=pl.BlockSpec((tm, tn), lambda i, j, k: (i, j)),
            scratch_shapes=[pltpu.VMEM((tm, tn), jnp.float32)],
        ),
        compiler_params=pltpu.CompilerParams(
            dimension_semantics=("parallel", "parallel", "arbitrary")),
    )


def _maxpool_kernel(x_ref, o_ref):
    r = x_ref[0]
    for i in range(1, x_ref.shape[0]):
        r = jnp.maximum(r, x_ref[i])
    o_ref[...] = r


# --------------------------------------------------------------------------- #
# JAX glue: conv wrapper, maxpool, upsampling
# --------------------------------------------------------------------------- #
def conv_bn_act(x, w, scale, bias, *, stride=1, pad=0, act="id",
                residual=None, res_mode=None, out_dtype=jnp.bfloat16):
    """Conv (HWIO weights) + folded BN scale/bias + activation (+ residual).

    MXU inputs (patches, weights, residual) are bf16; accumulation and the
    epilogue run in f32; output dtype selectable (bf16 between layers)."""
    kh, kw, cin, cout = w.shape
    N, H, W, _ = x.shape
    Ho = (H + 2 * pad - kh) // stride + 1
    Wo = (W + 2 * pad - kw) // stride + 1
    M, K = N * Ho * Wo, kh * kw * cin

    tm, Mp = _pick_block(M, _CAP_MN, _SUB)
    tn, Np = _pick_block(cout, _CAP_MN, _LANE)
    tk, Kp = _pick_k_block(K)
    tm, tn = _split_for_megacore(tm, tn, Mp, Np)

    x = x.astype(jnp.bfloat16)
    if kh == 1 and kw == 1 and stride == 1 and pad == 0:
        patches = x.reshape(M, K)                    # 1x1 conv: no im2col copy
    else:
        xp = jnp.pad(x, ((0, 0), (pad, pad), (pad, pad), (0, 0))) if pad > 0 else x
        cols = [xp[:, i:i + stride * (Ho - 1) + 1:stride,
                   j:j + stride * (Wo - 1) + 1:stride, :]
                for i in range(kh) for j in range(kw)]
        patches = jnp.concatenate(cols, axis=-1).reshape(M, K)    # bf16 patches

    A = jnp.pad(patches, ((0, Mp - M), (0, Kp - K)))              # single bf16 pad
    B = jnp.pad(w.reshape(K, cout).astype(jnp.bfloat16),
                ((0, Kp - K), (0, Np - cout)))
    S = jnp.pad(scale.astype(jnp.float32).reshape(1, cout),
                ((0, 0), (0, Np - cout)))
    Bi = jnp.pad(bias.astype(jnp.float32).reshape(1, cout),
                 ((0, 0), (0, Np - cout)))
    args = [A, B, S, Bi]
    mode = None
    if residual is not None:
        R = jnp.pad(residual.astype(jnp.bfloat16).reshape(M, cout),
                    ((0, Mp - M), (0, Np - cout)))
        args.append(R)
        mode = res_mode

    out = _build_conv_matmul(Mp, Kp, Np, tm, tn, tk, act, mode,
                             jnp.dtype(out_dtype).name)(*args)
    return out[:M, :cout].reshape(N, Ho, Wo, cout)


def maxpool_3x3_s2_p1(x):
    N, H, W, C = x.shape
    Ho = (H + 2 - 3) // 2 + 1
    Wo = (W + 2 - 3) // 2 + 1
    xp = jnp.pad(x, ((0, 0), (1, 1), (1, 1), (0, 0)), constant_values=-jnp.inf)
    views = [xp[:, i:i + 2 * (Ho - 1) + 1:2, j:j + 2 * (Wo - 1) + 1:2, :]
             for i in range(3) for j in range(3)]
    M = N * Ho * Wo
    stacked = jnp.stack(views, axis=0).reshape(9, M, C)           # bf16 views
    bm, Mp = _pick_block(M, 256, _SUB)
    bc, Cp = _pick_block(C, 256, _LANE)
    stacked = jnp.pad(stacked, ((0, 0), (0, Mp - M), (0, Cp - C)),
                      constant_values=-jnp.inf)
    out = pl.pallas_call(
        _maxpool_kernel,
        out_shape=jax.ShapeDtypeStruct((Mp, Cp), x.dtype),
        grid_spec=pltpu.PrefetchScalarGridSpec(
            num_scalar_prefetch=0,
            grid=(Mp // bm, Cp // bc),
            in_specs=[pl.BlockSpec((9, bm, bc), lambda i, j: (0, i, j))],
            out_specs=pl.BlockSpec((bm, bc), lambda i, j: (i, j)),
        ),
        compiler_params=pltpu.CompilerParams(
            dimension_semantics=("parallel", "parallel")),
    )(stacked)
    return out[:M, :C].reshape(N, Ho, Wo, C)


def upsample_bilinear_x2_align_corners(x):
    # nn.Upsample(scale_factor=2, mode='bilinear', align_corners=True), in bf16.
    N, H, W, C = x.shape
    Ho, Wo = 2 * H, 2 * W

    def coords(n_in, n_out):
        if n_in == 1:
            z = jnp.zeros((n_out,), jnp.int32)
            return z, z, jnp.zeros((n_out,), jnp.float32)
        src = jnp.arange(n_out, dtype=jnp.float32) * (n_in - 1) / (n_out - 1)
        i0 = jnp.floor(src).astype(jnp.int32)
        i1 = jnp.minimum(i0 + 1, n_in - 1)
        return i0, i1, src - i0.astype(jnp.float32)

    h0, h1, wh = coords(H, Ho)
    w0, w1, ww = coords(W, Wo)
    wh = wh.astype(x.dtype)
    ww = ww.astype(x.dtype)
    one = jnp.asarray(1.0, x.dtype)
    rows = (x[:, h0, :, :] * (one - wh)[None, :, None, None]
            + x[:, h1, :, :] * wh[None, :, None, None])
    return (rows[:, :, w0, :] * (one - ww)[None, None, :, None]
            + rows[:, :, w1, :] * ww[None, None, :, None])


# --------------------------------------------------------------------------- #
# Deterministic parameter initialization (synthetic; no checkpoint loading)
# --------------------------------------------------------------------------- #
class _ParamGen:
    def __init__(self, seed):
        self._key = jax.random.PRNGKey(seed)

    def _next(self):
        self._key, sub = jax.random.split(self._key)
        return sub

    def conv(self, kh, kw, cin, cout):
        fan_in = kh * kw * cin
        return jax.random.normal(self._next(), (kh, kw, cin, cout),
                                 jnp.float32) * (fan_in ** -0.5)

    def vec(self, c, scale=0.1):
        return jax.random.normal(self._next(), (c,), jnp.float32) * scale

    def bn(self, c, eps=1e-5):
        # TODO(synk): training-mode BatchNorm (batch statistics) not reproduced;
        # folded in inference mode: y = scale * x + bias.
        gamma = 1.0 + 0.1 * jax.random.normal(self._next(), (c,), jnp.float32)
        beta = 0.1 * jax.random.normal(self._next(), (c,), jnp.float32)
        mean = 0.1 * jax.random.normal(self._next(), (c,), jnp.float32)
        var = 1.0 + 0.1 * jnp.abs(jax.random.normal(self._next(), (c,), jnp.float32))
        scale = gamma / jnp.sqrt(var + eps)
        bias = beta - mean * scale
        return scale, bias


def init_params(seed, in_channels, out_channels):
    pg = _ParamGen(seed)
    P = {}
    P["conv1_w"] = pg.conv(7, 7, in_channels, 64)        # bias=False
    P["bn1"] = pg.bn(64)

    def make_layer(inplanes, planes, blocks, stride):
        layer, cin = [], inplanes
        for b in range(blocks):
            s = stride if b == 0 else 1
            blk = {
                "stride": s,
                "conv1_w": pg.conv(1, 1, cin, planes), "bn1": pg.bn(planes),
                "conv2_w": pg.conv(3, 3, planes, planes), "bn2": pg.bn(planes),
                "conv3_w": pg.conv(1, 1, planes, planes * 4), "bn3": pg.bn(planes * 4),
            }
            if b == 0:
                blk["down_w"] = pg.conv(1, 1, cin, planes * 4)
                blk["down_bn"] = pg.bn(planes * 4)
            layer.append(blk)
            cin = planes * 4
        return layer

    P["layer1"] = make_layer(64, 64, 3, 1)
    P["layer2"] = make_layer(256, 128, 4, 2)
    P["layer3"] = make_layer(512, 256, 6, 2)
    P["layer4"] = make_layer(1024, 512, 3, 2)

    def trans(cin, cout):
        w = pg.conv(3, 3, cin, cout)
        b = pg.vec(cout)                     # conv bias, folded into BN bias
        s_bn, b_bn = pg.bn(cout)
        return {"w": w, "scale": s_bn, "bias": s_bn * b + b_bn}

    P["trans1"] = trans(2048, 1024)
    P["trans2"] = trans(1024, 512)
    P["trans3"] = trans(512, 256)
    P["trans4"] = trans(256, 64)
    P["trans5"] = trans(64, 64)
    P["pred_w"] = pg.conv(1, 1, 64, out_channels)
    P["pred_b"] = pg.vec(out_channels)
    return P


# --------------------------------------------------------------------------- #
# Forward pass
# --------------------------------------------------------------------------- #
def bottleneck(x, blk):
    s = blk["stride"]
    if "down_w" in blk:
        ds, db = blk["down_bn"]
        identity = conv_bn_act(x, blk["down_w"], ds, db, stride=s, pad=0, act="id")
    else:
        identity = x
    s1, b1 = blk["bn1"]
    s2, b2 = blk["bn2"]
    s3, b3 = blk["bn3"]
    out = conv_bn_act(x, blk["conv1_w"], s1, b1, stride=1, pad=0, act="relu")
    out = conv_bn_act(out, blk["conv2_w"], s2, b2, stride=s, pad=1, act="relu")
    out = conv_bn_act(out, blk["conv3_w"], s3, b3, stride=1, pad=0, act="relu",
                      residual=identity, res_mode="pre_act")
    return out


def trans_conv(x, p, skip=None):
    xu = upsample_bilinear_x2_align_corners(x)
    return conv_bn_act(xu, p["w"], p["scale"], p["bias"], stride=1, pad=1,
                       act="gelu", residual=skip,
                       res_mode="post_act" if skip is not None else None)


def resnet_forward(x_nchw, P):
    x = jnp.transpose(x_nchw, (0, 2, 3, 1))                       # NCHW -> NHWC
    s1, b1 = P["bn1"]
    x_d2 = conv_bn_act(x, P["conv1_w"], s1, b1, stride=2, pad=3, act="relu")
    x_d4 = maxpool_3x3_s2_p1(x_d2)
    for blk in P["layer1"]:
        x_d4 = bottleneck(x_d4, blk)
    x_d8 = x_d4
    for blk in P["layer2"]:
        x_d8 = bottleneck(x_d8, blk)
    x_d16 = x_d8
    for blk in P["layer3"]:
        x_d16 = bottleneck(x_d16, blk)
    x_d32 = x_d16
    for blk in P["layer4"]:
        x_d32 = bottleneck(x_d32, blk)

    x_up_d16 = trans_conv(x_d32, P["trans1"], skip=x_d16)
    x_up_d8 = trans_conv(x_up_d16, P["trans2"], skip=x_d8)
    x_up_d4 = trans_conv(x_up_d8, P["trans3"], skip=x_d4)
    x_up_d2 = trans_conv(x_up_d4, P["trans4"], skip=x_d2)
    x_up_d1 = trans_conv(x_up_d2, P["trans5"], skip=None)

    oc = P["pred_w"].shape[-1]
    logits = conv_bn_act(x_up_d1, P["pred_w"], jnp.ones((oc,), jnp.float32),
                         P["pred_b"], stride=1, pad=0, act="sigmoid",
                         out_dtype=jnp.float32)                   # f32 final layer
    return jnp.transpose(logits, (0, 3, 1, 2))                    # NHWC -> NCHW


if __name__ == "__main__":
    in_channels, out_channels = 4, 7
    N, H, W = 2, 32, 32        # spatial must be divisible by 32 (module's skips)

    key = jax.random.PRNGKey(0)
    x = jax.random.normal(key, (N, in_channels, H, W), jnp.float32)  # NCHW input
    params = init_params(seed=0, in_channels=in_channels, out_channels=out_channels)

    y = resnet_forward(x, params)
    y = jax.block_until_ready(y)
    assert y.shape == (N, out_channels, H, W), y.shape
    assert bool(jnp.all(jnp.isfinite(y)))
    assert bool(jnp.all((y >= 0.0) & (y <= 1.0)))   # sigmoid output range
    print("KERNEL_OK")
</pallas_src>

<mosaic_0001>
module attributes {stable_mosaic.version = 11 : i64} {
  func.func @kernel(%arg0: i32, %arg1: i32, %arg2: i32, %arg3: memref<256x256xbf16, #tpu.memory_space<vmem>>, %arg4: memref<256x128xbf16, #tpu.memory_space<vmem>>, %arg5: memref<1x128xf32, #tpu.memory_space<vmem>>, %arg6: memref<1x128xf32, #tpu.memory_space<vmem>>, %arg7: memref<256x128xbf16, #tpu.memory_space<vmem>>, %arg8: memref<256x128xf32, #tpu.memory_space<vmem>>) attributes {dimension_semantics = [#tpu.dimension_semantics<parallel>, #tpu.dimension_semantics<parallel>, #tpu.dimension_semantics<arbitrary>], iteration_bounds = array<i64: 2, 1, 1>, scalar_prefetch = 0 : i64, scratch_operands = 1 : i64, tpu.core_type = #tpu.core_type<tc>, window_params = [{transform_indices = @transform_0, window_bounds = array<i64: 256, 256>}, {transform_indices = @transform_1, window_bounds = array<i64: 256, 128>}, {transform_indices = @transform_2, window_bounds = array<i64: 1, 128>}, {transform_indices = @transform_3, window_bounds = array<i64: 1, 128>}, {transform_indices = @transform_4, window_bounds = array<i64: 256, 128>}]} {
    %c0_i32 = arith.constant 0 : i32
    %0 = arith.cmpi eq, %arg2, %c0_i32 : i32
    %1 = arith.extui %0 : i1 to i32
    %c0_i32_0 = arith.constant 0 : i32
    %2 = arith.cmpi ne, %1, %c0_i32_0 : i32
    scf.if %2 {
      %cst_10 = arith.constant 0.000000e+00 : f32
      %12 = vector.broadcast %cst_10 : f32 to vector<256x128xf32>
      %c0_11 = arith.constant 0 : index
      %c0_12 = arith.constant 0 : index
      %13 = vector.load %arg8[%c0_11, %c0_12] : memref<256x128xf32, #tpu.memory_space<vmem>>, vector<256x128xf32>
      tpu.vector_store %arg8[%c0_11, %c0_12], %12 {strides = array<i32>} : memref<256x128xf32, #tpu.memory_space<vmem>>, vector<256x128xf32>,
    } else {
    }
    %c0 = arith.constant 0 : index
    %c0_1 = arith.constant 0 : index
    %3 = vector.load %arg8[%c0, %c0_1] : memref<256x128xf32, #tpu.memory_space<vmem>>, vector<256x128xf32>
    %c0_2 = arith.constant 0 : index
    %c0_3 = arith.constant 0 : index
    %4 = vector.load %arg3[%c0_2, %c0_3] : memref<256x256xbf16, #tpu.memory_space<vmem>>, vector<256x256xbf16>
    %c0_4 = arith.constant 0 : index
    %c0_5 = arith.constant 0 : index
    %5 = vector.load %arg4[%c0_4, %c0_5] : memref<256x128xbf16, #tpu.memory_space<vmem>>, vector<256x128xbf16>
    %cst = arith.constant dense<0.000000e+00> : vector<256x128xf32>
    %6 = tpu.matmul %4, %5, %cst {dimension_numbers = #tpu.dot_dimension_numbers<[1], [0], [0], [1], [0, 0, 1, 1], [], []>} : vector<256x256xbf16>, vector<256x128xbf16>, vector<256x128xf32> -> vector<256x128xf32>
    %7 = arith.addf %3, %6 : vector<256x128xf32>
    %c0_6 = arith.constant 0 : index
    %c0_7 = arith.constant 0 : index
    %8 = vector.load %arg8[%c0_6, %c0_7] : memref<256x128xf32, #tpu.memory_space<vmem>>, vector<256x128xf32>
    tpu.vector_store %arg8[%c0_6, %c0_7], %7 {strides = array<i32>} : memref<256x128xf32, #tpu.memory_space<vmem>>, vector<256x128xf32>,
    %c0_i32_8 = arith.constant 0 : i32
    %9 = arith.cmpi eq, %arg2, %c0_i32_8 : i32
    %10 = arith.extui %9 : i1 to i32
    %c0_i32_9 = arith.constant 0 : i32
    %11 = arith.cmpi ne, %10, %c0_i32_9 : i32
    scf.if %11 {
      %c0_10 = arith.constant 0 : index
      %c0_11 = arith.constant 0 : index
      %12 = vector.load %arg8[%c0_10, %c0_11] : memref<256x128xf32, #tpu.memory_space<vmem>>, vector<256x128xf32>
      %c0_12 = arith.constant 0 : index
      %c0_13 = arith.constant 0 : index
      %13 = vector.load %arg5[%c0_12, %c0_13] : memref<1x128xf32, #tpu.memory_space<vmem>>, vector<1x128xf32>
      %14 = vector.broadcast %13 : vector<1x128xf32> to vector<256x128xf32>
      %15 = arith.mulf %12, %14 : vector<256x128xf32>
      %c0_14 = arith.constant 0 : index
      %c0_15 = arith.constant 0 : index
      %16 = vector.load %arg6[%c0_14, %c0_15] : memref<1x128xf32, #tpu.memory_space<vmem>>, vector<1x128xf32>
      %17 = vector.broadcast %16 : vector<1x128xf32> to vector<256x128xf32>
      %18 = arith.addf %15, %17 : vector<256x128xf32>
      %cst_16 = arith.constant 0.000000e+00 : f32
      %19 = vector.broadcast %cst_16 : f32 to vector<256x128xf32>
      %20 = arith.maximumf %18, %19 : vector<256x128xf32>
      %21 = arith.truncf %20 : vector<256x128xf32> to vector<256x128xbf16>
      %c0_17 = arith.constant 0 : index
      %c0_18 = arith.constant 0 : index
      %22 = vector.load %arg7[%c0_17, %c0_18] : memref<256x128xbf16, #tpu.memory_space<vmem>>, vector<256x128xbf16>
      tpu.vector_store %arg7[%c0_17, %c0_18], %21 {strides = array<i32>} : memref<256x128xbf16, #tpu.memory_space<vmem>>, vector<256x128xbf16>,
    } else {
    }
    return
  }
  func.func @transform_0(%arg0: i32, %arg1: i32, %arg2: i32) -> (i32, i32) {
    %c0_i32 = arith.constant 0 : i32
    return %arg0, %arg2 : i32, i32
  }
  func.func @transform_1(%arg0: i32, %arg1: i32, %arg2: i32) -> (i32, i32) {
    %c0_i32 = arith.constant 0 : i32
    return %arg2, %arg1 : i32, i32
  }
  func.func @transform_2(%arg0: i32, %arg1: i32, %arg2: i32) -> (i32, i32) {
    %c0_i32 = arith.constant 0 : i32
    %c0_i32_0 = arith.constant 0 : i32
    return %c0_i32, %arg1 : i32, i32
  }
  func.func @transform_3(%arg0: i32, %arg1: i32, %arg2: i32) -> (i32, i32) {
    %c0_i32 = arith.constant 0 : i32
    %c0_i32_0 = arith.constant 0 : i32
    return %c0_i32, %arg1 : i32, i32
  }
  func.func @transform_4(%arg0: i32, %arg1: i32, %arg2: i32) -> (i32, i32) {
    %c0_i32 = arith.constant 0 : i32
    return %arg0, %arg1 : i32, i32
  }
}

</mosaic_0001>

<bundles_post_ra>
// kernel: tpu_custom_call.1
= control target key start
LH: loop header
LB: loop body
LE: loop exit
PB: predicated region body
PF: predicated region fallthrough
CT: control target
= control target key end

     0   :  { %s2347_s0 = inlined_call_operand.hbm [shape: bf16[512,256], index: 0, kind: input, shape index: {}]   ;;  %s2348_s1 = inlined_call_operand.hbm [shape: bf16[256,128], index: 1, kind: input, shape index: {}]   ;;  %s2349_s2 = inlined_call_operand.vmem [shape: f32[1,128], index: 2, kind: input, shape index: {}]   ;;  %s2350_s3 = inlined_call_operand.vmem [shape: f32[1,128], index: 3, kind: input, shape index: {}]   ;;  %s2351_s4 = inlined_call_operand.hbm [shape: bf16[512,128], index: 4, kind: output, shape index: {}]  }
   0x1   :  { %2353 = sst [smem:[#allocation12_spill]] %s2348_s1 }
   0x2   :  { %9 = vsyncpa [#allocation4], 0 }
   0x3   :  { %11 = vsyncpa [#allocation4 + $0x1], 0 }
   0x4   :  { %12 = vsyncpa [#allocation7], 0 }
   0x5   :  { %13 = vsyncpa [#allocation5], 0 }
   0x6   :  { %15 = vsyncpa [#allocation5 + $0x1], 0  ;;  %s2038_s15 = smov 0   ;;  %s2040_s16 = smov 0  }
   0x7   :  { %s2042_s17 = smov 0   ;;  %s2044_s18 = smov 0  }
   0x8   :  { %s2046_s19 = smov 0   ;;  %s2048_s20 = smov 0  }
   0x9 LB: > { %s1361_s21 = sadd.s32 4294967295, %s2002_s20   ;;  %s1362_s22 = sadd.s32 4294967294, %s2002_s20   ;;  %s2002_s20 = sphi %s2048_s20, %s21_s20   ;;  %s1998_s19 = sphi %s2046_s19, %s2371_s19   ;;  %s1994_s18 = sphi %s2044_s18, %s2370_s18   ;;  %s1990_s17 = sphi %s2042_s17, %s2369_s17   ;;  %s1986_s16 = sphi %s2040_s16, %s2368_s16   ;;  %s1982_s15 = sphi %s2038_s15, %s2367_s15  }
   0xa   : > { %p62_p0 = scmp.ne.s32.totalorder %s1986_s16, %s1982_s15  ;;  %p2072_p1 = scmp.eq.s32.totalorder %s1361_s21, 0 }
   0xb   : > { %p2076_p2 = scmp.eq.s32.totalorder %s1361_s21, 1  ;;  %p174_p3 = scmp.eq.s32.totalorder %s1362_s22, 1 }
   0xc   : > { %p2082_p4 = por %p2072_p1, %p62_p0  ;;  %p1363_p5 = scmp.ge.s32.totalorder %s2002_s20, 1 }
   0xd   : > { %p2087_p6 = por %p174_p3, %p62_p0  ;;  %p181_p7 = scmp.lt.s32.totalorder %s2002_s20, 3 }
   0xe   : > { %s2356_s25 = scalar_select %p2082_p4, 1, 0 }
   0xf   : > { %s2357_s26 = scalar_select %p2087_p6, 1, 0 }
  0x10   : > { %p2092_p8 = pnand %p1363_p5, %p181_p7  ;;  %s2004_s28 = smov [#allocation6]  }
  0x11   : > { %s197_s29 = sshll.u32 %s2004_s28, 4  ;;  %s40_s5 = sadd.s32 1, %s1998_s19  ;;  %s198_s29 = int_to_ptr.vmem [resolvable:$true] %s197_s29 }
  0x12   : > { %p1729_p9 = pneg %p2092_p8  ;;  %s1875_s6 = scalar_lea.vmem %s198_s29, 2048 }
  0x13   : > { %p1876_p13 = scmp.ne.s32.totalorder %s198_s29, %s1875_s6  ;;  %p1883_p5 = scmp.lt.s32.totalorder %s198_s29, %s198_s29 }
  0x14   : > { %p2101_p11 = pnand %p1729_p9, %p2072_p1  ;;  %p1884_p7 = scmp.lt.s32.totalorder %s1875_s6, %s1875_s6 }
  0x16   : > { %p1866_p12 = pneg %p2101_p11  ;;  %p1885_p6 = por %p1884_p7, %p1883_p5 }
  0x18   : > { %p1878_p0 = pnand %p1876_p13, %p1866_p12 }
  0x1a   : > { %p1879_p3 = pneg %p1878_p0 }
  0x1c   : > { %p1886_p4 = pnand %p1885_p6, %p1879_p3 }
  0x1e   : > { %1889 = shalt.err (!%p1886_p4)
}
  0x1f   : > { %s2005_s7 = smov 64   ;;  %s2006_s8 = smov 4  }
  0x20   : > { %s2360_s1 = sld [smem:[#allocation12_spill]]  ;;  %p42_p6 = scmp.ge.s32.totalorder %s40_s5, 2 }
  0x21   : > { %s49_s11 = sadd.s32 1, %s1990_s17  ;;  %p56_p4 = scmp.ne.s32.totalorder %s1990_s17, %s1986_s16 }
  0x22   : > { %p57_p9 = scmp.eq.s32.totalorder %s2002_s20, 0  ;;  %s2373_s5 = smov (%p42_p6, %s40_s5), 0 }
  0x23   : > { %p2125_p13 = por %p2076_p2, %p56_p4  ;;  %s44_s14 = ssub.s32 %s1998_s19, %s2373_s5 }
  0x24   : > { %p2119_p12 = por %p57_p9, %p56_p4  ;;  %p1742_p0 = scmp.lt.s32.totalorder %s2002_s20, 2 }
  0x25   : > { %s223_s21 = sand.u32 1, %s1990_s17  }
  0x26   : > { %1732 = dma.hbm_to_vmem [thread:$0]  (!%p2101_p11), %s2360_s1, 2048, %s198_s29, [#allocation7], %s2005_s7, %s2005_s7, %s2006_s8  }
  0x27   : > { %p47_p11 = scmp.eq.s32.totalorder %s44_s14, 0  ;;  %s1368_s22 = sshll.u32 %s223_s21, 8 }
  0x28   : > { %s1464_s29 = sshll.u32 %s1998_s19, 12  ;;  %s227_s8 = scalar_lea.vmem [#allocation3], %s1368_s22 }
  0x29   : > { %s2134_s28 = scalar_select %p47_p11, %s1990_s17, %s49_s11  }
  0x2a   : > { %s236_s7 = scalar_lea.hbm %s2347_s0, %s1464_s29  ;;  %s237_s9 = sshll.u32 %s227_s8, 4  ;;  %s238_s9 = int_to_ptr.vmem [resolvable:$true] %s237_s9 }
  0x2b   : > { %p2142_p2 = pnand %p1742_p0, %p2119_p12  ;;  %s224_s10 = scalar_lea.sflag [#allocation4], %s223_s21 }
  0x2c   : > { %s1903_s14 = scalar_lea.vmem %s238_s9, 4096  ;;  %s2007_s11 = smov [#allocation3]  }
  0x2d   : > { %p1892_p3 = pneg %p2142_p2  ;;  %p1904_p5 = scmp.ne.s32.totalorder %s238_s9, %s1903_s14 }
  0x2e   : > { %s1908_s1 = sshll.u32 %s2007_s11, 4  ;;  %s1909_s1 = int_to_ptr.vmem [resolvable:$false] %s1908_s1 }
  0x2f   : > { %p1906_p7 = pnand %p1904_p5, %p1892_p3  ;;  %s1910_s29 = scalar_lea.vmem %s1909_s1, 8192 }
  0x30   : > { %p1911_p4 = scmp.lt.s32.totalorder %s238_s9, %s1909_s1  ;;  %p1912_p9 = scmp.lt.s32.totalorder %s1910_s29, %s1903_s14 }
  0x31   : > { %p1907_p6 = pneg %p1906_p7 }
  0x32   : > { %p1913_p11 = por %p1912_p9, %p1911_p4 }
  0x34   : > { %p1914_p10 = pnand %p1913_p11, %p1907_p6 }
  0x36   : > { %1917 = shalt.err (!%p1914_p10)
}
  0x37   : > { %s2008_s12 = smov 128   ;;  %s2009_s22 = smov 8  }
  0x38   : > { %1736 = dma.hbm_to_vmem [thread:$0]  (!%p2142_p2), %s236_s7, 4096, %s238_s9, %s224_s10, %s2008_s12, %s2008_s12, %s2009_s22  }
  0x39   : > { %249 = sbr.rel (%p2092_p8) target bundleno = 377 (0x179), region = 36  ;;  %s2153_s21 = sand.u32 (!%p2092_p8), 1, %s1986_s16  }
  0x3a   : > { %s1373_s30 = sshll.u32 (!%p2092_p8), %s2153_s21, 8  ;;  %s252_s1 = scalar_lea.sflag (!%p2092_p8), [#allocation4], %s2153_s21 }
  0x3b   : > { %s2157_s6 = scalar_lea.vmem (!%p2092_p8), [#allocation3], %s1373_s30  ;;  %p2364_p12 = scmp.ne.s32.totalorder (!%p2092_p8), %s2356_s25, 0 }
  0x3e   : > { %1969 = dma.done.wait (%p2364_p12), %s252_s1, 4096  }
  0x3f   : > { %1971 = vsyncadd (%p2364_p12), %s252_s1, 4294963200 }
  0x40   : > { %1973 = dma.done.wait (%p2072_p1), [#allocation7], 2048  }
  0x41   : > { %1975 = vsyncadd (%p2072_p1), [#allocation7], 4294965248  ;;  %v1800_v0 = vld [vmem:[#allocation6 + $0x78] sm:$0xff]   ;;  %v1802_v2 = vld [vmem:[#allocation6 + $0x70] sm:$0xff]   ;;  %s1375_s8 = sshll.u32 %s2153_s21, 7  ;;  %s1497_s24 = sshll.u32 %s1994_s18, 11 }
  0x42   : > { %v1801_v1 = vld [vmem:[#allocation6 + $0x38] sm:$0xff]   ;;  %1593 = vmatprep.subr.bf16.mxu0 %v1800_v0  ;;  %1705 = vmatprep.subr.bf16.mxu1 %v1800_v0  ;;  %v1803_v3 = vld [vmem:[#allocation6 + $0x30] sm:$0xff]   ;;  %v1804_v4 = vld [vmem:[#allocation6 + $0x68] sm:$0xff]   ;;  %s2220_s9 = scalar_lea.vmem [#allocation8], %s1375_s8  ;;  %s2295_s29 = scalar_lea.hbm %s2351_s4, %s1497_s24 }
  0x43   : > { %1594 = vmatpush3.bf16.msra.mxu0 %v1801_v1  ;;  %1713 = vmatpush3.bf16.msra.mxu1 %v1801_v1  ;;  %v1805_v5 = vld [vmem:[#allocation6 + $0x28] sm:$0xff]   ;;  %v1806_v6 = vld [vmem:[#allocation6 + $0x60] sm:$0xff]   ;;  %v1808_v8 = vld [vmem:[#allocation6 + $0x58] sm:$0xff]   ;;  %s1234_s10 = sshll.u32 %s2220_s9, 4  ;;  %s1220_s18 = scalar_lea.sflag [#allocation5], %s2153_s21  ;;  %s2297_s10 = int_to_ptr.vmem [resolvable:$true] %s1234_s10 }
  0x44   : > { %1595 = vmatprep.subr.bf16.mxu0 %v1802_v2  ;;  %1706 = vmatprep.subr.bf16.mxu1 %v1802_v2  ;;  %v1807_v7 = vld [vmem:[#allocation6 + $0x20] sm:$0xff]   ;;  %v1809_v9 = vld [vmem:[#allocation6 + $0x18] sm:$0xff]   ;;  %v1810_v10 = vld [vmem:[#allocation6 + $0x50] sm:$0xff]   ;;  %s1918_s12 = scalar_lea.vmem %s2297_s10, 2048  ;;  %s2010_s22 = smov [#allocation8]  }
  0x45   : > { %v1818_v11 = vld [vmem:[%s2157_s6 + $0x4] ss:$8 sps:$4 sm:$0xff]   ;;  %v1811_v13 = vld [vmem:[#allocation6 + $0x10] sm:$0xff]   ;;  %v1816_v18 = vld [vmem:[%s2157_s6] ss:$8 sps:$4 sm:$0xff]   ;;  %p1919_p1 = scmp.ne.s32.totalorder %s2297_s10, %s1918_s12  ;;  %s1922_s30 = sshll.u32 %s2010_s22, 4  ;;  %s1923_s30 = int_to_ptr.vmem [resolvable:$false] %s1922_s30 }
  0x46   : > { %v1821_v12 = vld [vmem:[%s2157_s6 + $0x84] ss:$8 sps:$4 sm:$0xff]   ;;  %721 = vmatprep.mubr.bf16.mxu0 %v1818_v11  ;;  %v1819_v19 = vld [vmem:[%s2157_s6 + $0x80] ss:$8 sps:$4 sm:$0xff]   ;;  %v1822_v20 = vld [vmem:[%s2157_s6 + $0x14] ss:$8 sps:$4 sm:$0xff]   ;;  %p1925_p0 = scmp.lt.s32.totalorder %s2297_s10, %s1923_s30 }
  0x47   : > { %1596 = vmatpush3.bf16.msra.mxu0 %v1803_v3  ;;  %1714 = vmatpush3.bf16.msra.mxu1 %v1803_v3  ;;  %v1812_v14 = vld [vmem:[#allocation6 + $0x48] sm:$0xff]   ;;  %v1814_v16 = vld [vmem:[#allocation6 + $0x40] sm:$0xff]   ;;  %v1824_v21 = vld [vmem:[%s2157_s6 + $0x94] ss:$8 sps:$4 sm:$0xff]   ;;  %p1920_p8 = pnand %p1919_p1, %p2125_p13  ;;  %s1924_s1 = scalar_lea.vmem %s1923_s30, 4096 }
  0x48   : > { %1597 = vmatprep.subr.bf16.mxu0 %v1804_v4  ;;  %1707 = vmatprep.subr.bf16.mxu1 %v1804_v4  ;;  %v1813_v15 = vld [vmem:[#allocation6 + $0x8] sm:$0xff]   ;;  %v1815_v17 = vld [vmem:[#allocation6] sm:$0xff]   ;;  %v1826_v22 = vld [vmem:[%s2157_s6 + $0x10] ss:$8 sps:$4 sm:$0xff]   ;;  %p1926_p2 = scmp.lt.s32.totalorder %s1924_s1, %s1918_s12 }
  0x49   : > { %785 = vmatprep.mubr.bf16.mxu1 %v1821_v12  ;;  %v1827_v23 = vld [vmem:[%s2157_s6 + $0x90] ss:$8 sps:$4 sm:$0xff]   ;;  %v1828_v24 = vld [vmem:[%s2157_s6 + $0x24] ss:$8 sps:$4 sm:$0xff]   ;;  %v1832_v26 = vld [vmem:[%s2157_s6 + $0x20] ss:$8 sps:$4 sm:$0xff]   ;;  %p1921_p10 = pneg %p1920_p8 }
  0x4a   : > { %v1830_v25 = vld [vmem:[%s2157_s6 + $0xa4] ss:$8 sps:$4 sm:$0xff]   ;;  %v1833_v27 = vld [vmem:[%s2157_s6 + $0xa0] ss:$8 sps:$4 sm:$0xff]   ;;  %v1834_v28 = vld [vmem:[%s2157_s6 + $0x34] ss:$8 sps:$4 sm:$0xff]   ;;  %p1927_p3 = por %p1926_p2, %p1925_p0 }
  0x4b   : > { %1598 = vmatpush3.bf16.msra.mxu0 %v1805_v5  ;;  %1715 = vmatpush3.bf16.msra.mxu1 %v1805_v5  ;;  %v1836_v29 = vld [vmem:[%s2157_s6 + $0xb4] ss:$8 sps:$4 sm:$0xff]   ;;  %v1838_v30 = vld [vmem:[%s2157_s6 + $0x30] ss:$8 sps:$4 sm:$0xff]   ;;  %v1840_v32 = vld [vmem:[%s2157_s6 + $0x44] ss:$8 sps:$4 sm:$0xff]  }
  0x4c   : > { %1599 = vmatprep.subr.bf16.mxu0 %v1806_v6  ;;  %1708 = vmatprep.subr.bf16.mxu1 %v1806_v6  ;;  %v1839_v31 = vld [vmem:[%s2157_s6 + $0xb0] ss:$8 sps:$4 sm:$0xff]   ;;  %v1842_v33 = vld [vmem:[%s2157_s6 + $0xc4] ss:$8 sps:$4 sm:$0xff]   ;;  %v1844_v34 = vld [vmem:[%s2157_s6 + $0x40] ss:$8 sps:$4 sm:$0xff]   ;;  %p1928_p5 = pnand %p1927_p3, %p1921_p10 }
  0x4d   : > { %v1845_v35 = vld [vmem:[%s2157_s6 + $0xc0] ss:$8 sps:$4 sm:$0xff]   ;;  %v1846_v36 = vld [vmem:[%s2157_s6 + $0x54] ss:$8 sps:$4 sm:$0xff]   ;;  %v1850_v38 = vld [vmem:[%s2157_s6 + $0x50] ss:$8 sps:$4 sm:$0xff]  }
  0x4e   : > { %v1848_v37 = vld [vmem:[%s2157_s6 + $0xd4] ss:$8 sps:$4 sm:$0xff]   ;;  %v1851_v39 = vld [vmem:[%s2157_s6 + $0xd0] ss:$8 sps:$4 sm:$0xff]   ;;  %v1852_v40 = vld [vmem:[%s2157_s6 + $0x64] ss:$8 sps:$4 sm:$0xff]  }
  0x4f   : > { %1600 = vmatpush3.bf16.msra.mxu0 %v1807_v7  ;;  %1716 = vmatpush3.bf16.msra.mxu1 %v1807_v7  ;;  %v1854_v41 = vld [vmem:[%s2157_s6 + $0xe4] ss:$8 sps:$4 sm:$0xff]   ;;  %v1856_v42 = vld [vmem:[%s2157_s6 + $0x60] ss:$8 sps:$4 sm:$0xff]   ;;  %v1858_v44 = vld [vmem:[%s2157_s6 + $0x74] ss:$8 sps:$4 sm:$0xff]  }
  0x50   : > { %1601 = vmatprep.subr.bf16.mxu0 %v1808_v8  ;;  %1709 = vmatprep.subr.bf16.mxu1 %v1808_v8  ;;  %v1857_v43 = vld [vmem:[%s2157_s6 + $0xe0] ss:$8 sps:$4 sm:$0xff]   ;;  %v1860_v45 = vld [vmem:[%s2157_s6 + $0xf4] ss:$8 sps:$4 sm:$0xff]   ;;  %v1862_v46 = vld [vmem:[%s2157_s6 + $0x70] ss:$8 sps:$4 sm:$0xff]  }
  0x51   : > { %v1863_v47 = vld [vmem:[%s2157_s6 + $0xf0] ss:$8 sps:$4 sm:$0xff]   ;;  %v2202_v51 = vld [vmem:[%s2349_s2] ss:$0 sm:$0xff] }
  0x52   : > { %v2209_v59 = vld [vmem:[%s2350_s3] ss:$0 sm:$0xff] }
  0x53   : > { %1602 = vmatpush3.bf16.msra.mxu0 %v1809_v9  ;;  %1717 = vmatpush3.bf16.msra.mxu1 %v1809_v9 }
  0x54   : > { %1603 = vmatprep.subr.bf16.mxu0 %v1810_v10  ;;  %1710 = vmatprep.subr.bf16.mxu1 %v1810_v10 }
  0x57   : > { %1604 = vmatpush3.bf16.msra.mxu0 %v1811_v13  ;;  %1718 = vmatpush3.bf16.msra.mxu1 %v1811_v13 }
  0x58   : > { %1605 = vmatprep.subr.bf16.mxu0 %v1812_v14  ;;  %1711 = vmatprep.subr.bf16.mxu1 %v1812_v14 }
  0x5b   : > { %1606 = vmatpush3.bf16.msra.mxu0 %v1813_v15  ;;  %1719 = vmatpush3.bf16.msra.mxu1 %v1813_v15 }
  0x5c   : > { %1607 = vmatprep.subr.bf16.mxu0 %v1814_v16  ;;  %1712 = vmatprep.subr.bf16.mxu1 %v1814_v16 }
  0x5f   : > { %1608 = vmatpush3.bf16.msra.mxu0 %v1815_v17  ;;  %1720 = vmatpush3.bf16.msra.mxu1 %v1815_v17 }
  0x62   : > { %722 = vmatmul.mubr.bf16.vlgmr.msra.gmra.mxu0 %v1816_v18  ;;  %786 = vmatmul.mubr.bf16.vlgmr.msra.gmra.mxu1 %v1819_v19 }
  0x63   : > { %729 = vmatprep.mubr.bf16.mxu0 %v1822_v20  ;;  %793 = vmatprep.mubr.bf16.mxu1 %v1824_v21 }
  0x6a   : > { %730 = vmatmul.mubr.bf16.gmra.mxu0 %v1826_v22  ;;  %794 = vmatmul.mubr.bf16.gmra.mxu1 %v1827_v23 }
  0x6b   : > { %737 = vmatprep.mubr.bf16.mxu0 %v1828_v24  ;;  %801 = vmatprep.mubr.bf16.mxu1 %v1830_v25 }
  0x72   : > { %738 = vmatmul.mubr.bf16.gmra.mxu0 %v1832_v26  ;;  %802 = vmatmul.mubr.bf16.gmra.mxu1 %v1833_v27 }
  0x73   : > { %745 = vmatprep.mubr.bf16.mxu0 %v1834_v28  ;;  %809 = vmatprep.mubr.bf16.mxu1 %v1836_v29 }
  0x7a   : > { %746 = vmatmul.mubr.bf16.gmra.mxu0 %v1838_v30  ;;  %810 = vmatmul.mubr.bf16.gmra.mxu1 %v1839_v31 }
  0x7b   : > { %753 = vmatprep.mubr.bf16.mxu0 %v1840_v32  ;;  %817 = vmatprep.mubr.bf16.mxu1 %v1842_v33 }
  0x82   : > { %754 = vmatmul.mubr.bf16.gmra.mxu0 %v1844_v34  ;;  %818 = vmatmul.mubr.bf16.gmra.mxu1 %v1845_v35 }
  0x83   : > { %761 = vmatprep.mubr.bf16.mxu0 %v1846_v36  ;;  %825 = vmatprep.mubr.bf16.mxu1 %v1848_v37 }
  0x8a   : > { %762 = vmatmul.mubr.bf16.gmra.mxu0 %v1850_v38  ;;  %826 = vmatmul.mubr.bf16.gmra.mxu1 %v1851_v39 }
  0x8b   : > { %769 = vmatprep.mubr.bf16.mxu0 %v1852_v40  ;;  %833 = vmatprep.mubr.bf16.mxu1 %v1854_v41 }
  0x92   : > { %770 = vmatmul.mubr.bf16.gmra.mxu0 %v1856_v42  ;;  %834 = vmatmul.mubr.bf16.gmra.mxu1 %v1857_v43 }
  0x93   : > { %777 = vmatprep.mubr.bf16.mxu0 %v1858_v44  ;;  %841 = vmatprep.mubr.bf16.mxu1 %v1860_v45 }
  0x9a   : > { %778 = vmatmul.mubr.bf16.gmra.mxu0 %v1862_v46  ;;  %842 = vmatmul.mubr.bf16.gmra.mxu1 %v1863_v47 }
 0x122   : > { %v1609_v48 = vpop.f32.mrf.mxu0  ;;  %v1657_v49 = vpop.f32.mrf.mxu1 }
 0x124   : > { %v1610_v50 = vpop.f32.mrf.mxu0  ;;  %v1658_v52 = vpop.f32.mrf.mxu1 }
 0x125   : > { %v1611_v53 = vadd.f32 %v1610_v50, %v1609_v48  ;;  %v1659_v54 = vadd.f32 %v1658_v52, %v1657_v49 }
 0x126   : > { %v1612_v55 = vpop.f32.mrf.mxu0  ;;  %v1660_v56 = vpop.f32.mrf.mxu1 }
 0x127   : > { %v956_v57 = vmul.f32 %v1611_v53, %v2202_v51  ;;  %v972_v58 = vmul.f32 %v1659_v54, %v2202_v51 }
 0x128   : > { %v1613_v60 = vpop.f32.mrf.mxu0  ;;  %v1661_v61 = vpop.f32.mrf.mxu1 }
 0x129   : > { %v1614_v62 = vadd.f32 %v1613_v60, %v1612_v55  ;;  %v1662_v63 = vadd.f32 %v1661_v61, %v1660_v56  ;;  %v995_v2 = vadd.f32 %v2209_v59, %v956_v57  ;;  %v1011_v3 = vadd.f32 %v2209_v59, %v972_v58 }
 0x12a   : > { %v1615_v0 = vpop.f32.mrf.mxu0  ;;  %v1663_v1 = vpop.f32.mrf.mxu1 }
 0x12b   : > { %v957_v4 = vmul.f32 %v1614_v62, %v2202_v51  ;;  %v973_v5 = vmul.f32 %v1662_v63, %v2202_v51  ;;  %v1027_v14 = vmax.f32 %v995_v2, 0.0  ;;  %v1043_v15 = vmax.f32 %v1011_v3, 0.0 }
 0x12c   : > { %v1616_v6 = vpop.f32.mrf.mxu0  ;;  %v1664_v7 = vpop.f32.mrf.mxu1 }
 0x12d   : > { %v996_v8 = vadd.f32 %v2209_v59, %v957_v4  ;;  %v1012_v9 = vadd.f32 %v2209_v59, %v973_v5  ;;  %v1617_v10 = vadd.f32 %v1616_v6, %v1615_v0  ;;  %v1665_v11 = vadd.f32 %v1664_v7, %v1663_v1 }
 0x12e   : > { %v1618_v12 = vpop.f32.mrf.mxu0  ;;  %v1666_v13 = vpop.f32.mrf.mxu1 }
 0x12f   : > { %v1028_v16 = vmax.f32 %v996_v8, 0.0  ;;  %v1044_v17 = vmax.f32 %v1012_v9, 0.0  ;;  %v958_v18 = vmul.f32 %v1617_v10, %v2202_v51  ;;  %v974_v19 = vmul.f32 %v1665_v11, %v2202_v51 }
 0x130   : > { %v1619_v20 = vpop.f32.mrf.mxu0  ;;  %v1667_v21 = vpop.f32.mrf.mxu1 }
 0x131   : > { %v1501_v22 = vpack.c.bf16 %v1028_v16, %v1027_v14  ;;  %v1541_v23 = vpack.c.bf16 %v1044_v17, %v1043_v15  ;;  %v1620_v24 = vadd.f32 %v1619_v20, %v1618_v12  ;;  %v1668_v25 = vadd.f32 %v1667_v21, %v1666_v13 }
 0x132   : > { %v1621_v26 = vpop.f32.mrf.mxu0  ;;  %v1669_v27 = vpop.f32.mrf.mxu1  ;;  %v997_v28 = vadd.f32 %v2209_v59, %v958_v18  ;;  %v1013_v29 = vadd.f32 %v2209_v59, %v974_v19 }
 0x133   : > { %1502 = vst [vmem:[%s2220_s9] sm:$0xff] %v1501_v22   ;;  %1585 = vst [vmem:[%s2220_s9 + $0x40] sm:$0xff] %v1541_v23   ;;  %v959_v30 = vmul.f32 %v1620_v24, %v2202_v51  ;;  %v975_v31 = vmul.f32 %v1668_v25, %v2202_v51 }
 0x134   : > { %v1622_v32 = vpop.f32.mrf.mxu0  ;;  %v1670_v33 = vpop.f32.mrf.mxu1  ;;  %v1029_v42 = vmax.f32 %v997_v28, 0.0  ;;  %v1045_v43 = vmax.f32 %v1013_v29, 0.0 }
 0x135   : > { %v1623_v34 = vadd.f32 %v1622_v32, %v1621_v26  ;;  %v1671_v35 = vadd.f32 %v1670_v33, %v1669_v27  ;;  %v998_v36 = vadd.f32 %v2209_v59, %v959_v30  ;;  %v1014_v37 = vadd.f32 %v2209_v59, %v975_v31 }
 0x136   : > { %v1624_v38 = vpop.f32.mrf.mxu0  ;;  %v1672_v39 = vpop.f32.mrf.mxu1 }
 0x137   : > { %v960_v40 = vmul.f32 %v1623_v34, %v2202_v51  ;;  %v976_v41 = vmul.f32 %v1671_v35, %v2202_v51  ;;  %v1030_v44 = vmax.f32 %v998_v36, 0.0  ;;  %v1046_v45 = vmax.f32 %v1014_v37, 0.0 }
 0x138   : > { %v1625_v46 = vpop.f32.mrf.mxu0  ;;  %v1673_v47 = vpop.f32.mrf.mxu1 }
 0x139   : > { %v1626_v48 = vadd.f32 %v1625_v46, %v1624_v38  ;;  %v1674_v49 = vadd.f32 %v1673_v47, %v1672_v39  ;;  %v1506_v50 = vpack.c.bf16 %v1030_v44, %v1029_v42  ;;  %v1546_v52 = vpack.c.bf16 %v1046_v45, %v1045_v43 }
 0x13a   : > { %v1627_v53 = vpop.f32.mrf.mxu0  ;;  %v1675_v54 = vpop.f32.mrf.mxu1  ;;  %v999_v55 = vadd.f32 %v2209_v59, %v960_v40  ;;  %v1015_v56 = vadd.f32 %v2209_v59, %v976_v41 }
 0x13b   : > { %v961_v57 = vmul.f32 %v1626_v48, %v2202_v51  ;;  %v977_v58 = vmul.f32 %v1674_v49, %v2202_v51  ;;  %1578 = vst [vmem:[%s2220_s9 + $0x8] sm:$0xff] %v1506_v50   ;;  %1586 = vst [vmem:[%s2220_s9 + $0x48] sm:$0xff] %v1546_v52  }
 0x13c   : > { %v1628_v60 = vpop.f32.mrf.mxu0  ;;  %v1676_v61 = vpop.f32.mrf.mxu1  ;;  %v1031_v4 = vmax.f32 %v999_v55, 0.0  ;;  %v1047_v5 = vmax.f32 %v1015_v56, 0.0 }
 0x13d   : > { %v1000_v62 = vadd.f32 %v2209_v59, %v961_v57  ;;  %v1016_v63 = vadd.f32 %v2209_v59, %v977_v58  ;;  %v1629_v0 = vadd.f32 %v1628_v60, %v1627_v53  ;;  %v1677_v1 = vadd.f32 %v1676_v61, %v1675_v54 }
 0x13e   : > { %v1630_v2 = vpop.f32.mrf.mxu0  ;;  %v1678_v3 = vpop.f32.mrf.mxu1 }
 0x13f   : > { %v1032_v6 = vmax.f32 %v1000_v62, 0.0  ;;  %v1048_v7 = vmax.f32 %v1016_v63, 0.0  ;;  %v962_v8 = vmul.f32 %v1629_v0, %v2202_v51  ;;  %v978_v9 = vmul.f32 %v1677_v1, %v2202_v51 }
 0x140   : > { %v1631_v10 = vpop.f32.mrf.mxu0  ;;  %v1679_v11 = vpop.f32.mrf.mxu1 }
 0x141   : > { %v1511_v12 = vpack.c.bf16 %v1032_v6, %v1031_v4  ;;  %v1551_v13 = vpack.c.bf16 %v1048_v7, %v1047_v5  ;;  %v1632_v14 = vadd.f32 %v1631_v10, %v1630_v2  ;;  %v1680_v15 = vadd.f32 %v1679_v11, %v1678_v3 }
 0x142   : > { %v1633_v16 = vpop.f32.mrf.mxu0  ;;  %v1681_v17 = vpop.f32.mrf.mxu1  ;;  %v1001_v18 = vadd.f32 %v2209_v59, %v962_v8  ;;  %v1017_v19 = vadd.f32 %v2209_v59, %v978_v9 }
 0x143   : > { %1579 = vst [vmem:[%s2220_s9 + $0x10] sm:$0xff] %v1511_v12   ;;  %1587 = vst [vmem:[%s2220_s9 + $0x50] sm:$0xff] %v1551_v13   ;;  %v963_v20 = vmul.f32 %v1632_v14, %v2202_v51  ;;  %v979_v21 = vmul.f32 %v1680_v15, %v2202_v51 }
 0x144   : > { %v1634_v22 = vpop.f32.mrf.mxu0  ;;  %v1682_v23 = vpop.f32.mrf.mxu1  ;;  %v1033_v32 = vmax.f32 %v1001_v18, 0.0  ;;  %v1049_v33 = vmax.f32 %v1017_v19, 0.0 }
 0x145   : > { %v1635_v24 = vadd.f32 %v1634_v22, %v1633_v16  ;;  %v1683_v25 = vadd.f32 %v1682_v23, %v1681_v17  ;;  %v1002_v26 = vadd.f32 %v2209_v59, %v963_v20  ;;  %v1018_v27 = vadd.f32 %v2209_v59, %v979_v21 }
 0x146   : > { %v1636_v28 = vpop.f32.mrf.mxu0  ;;  %v1684_v29 = vpop.f32.mrf.mxu1 }
 0x147   : > { %v964_v30 = vmul.f32 %v1635_v24, %v2202_v51  ;;  %v980_v31 = vmul.f32 %v1683_v25, %v2202_v51  ;;  %v1034_v34 = vmax.f32 %v1002_v26, 0.0  ;;  %v1050_v35 = vmax.f32 %v1018_v27, 0.0 }
 0x148   : > { %v1637_v36 = vpop.f32.mrf.mxu0  ;;  %v1685_v37 = vpop.f32.mrf.mxu1 }
 0x149   : > { %v1638_v38 = vadd.f32 %v1637_v36, %v1636_v28  ;;  %v1686_v39 = vadd.f32 %v1685_v37, %v1684_v29  ;;  %v1516_v40 = vpack.c.bf16 %v1034_v34, %v1033_v32  ;;  %v1556_v41 = vpack.c.bf16 %v1050_v35, %v1049_v33 }
 0x14a   : > { %v1639_v42 = vpop.f32.mrf.mxu0  ;;  %v1687_v43 = vpop.f32.mrf.mxu1  ;;  %v1003_v44 = vadd.f32 %v2209_v59, %v964_v30  ;;  %v1019_v45 = vadd.f32 %v2209_v59, %v980_v31 }
 0x14b   : > { %v965_v46 = vmul.f32 %v1638_v38, %v2202_v51  ;;  %v981_v47 = vmul.f32 %v1686_v39, %v2202_v51  ;;  %1580 = vst [vmem:[%s2220_s9 + $0x18] sm:$0xff] %v1516_v40   ;;  %1588 = vst [vmem:[%s2220_s9 + $0x58] sm:$0xff] %v1556_v41  }
 0x14c   : > { %v1640_v48 = vpop.f32.mrf.mxu0  ;;  %v1688_v49 = vpop.f32.mrf.mxu1  ;;  %v1035_v57 = vmax.f32 %v1003_v44, 0.0  ;;  %v1051_v58 = vmax.f32 %v1019_v45, 0.0 }
 0x14d   : > { %v1004_v50 = vadd.f32 %v2209_v59, %v965_v46  ;;  %v1020_v52 = vadd.f32 %v2209_v59, %v981_v47  ;;  %v1641_v53 = vadd.f32 %v1640_v48, %v1639_v42  ;;  %v1689_v54 = vadd.f32 %v1688_v49, %v1687_v43 }
 0x14e   : > { %v1642_v55 = vpop.f32.mrf.mxu0  ;;  %v1690_v56 = vpop.f32.mrf.mxu1 }
 0x14f   : > { %v1036_v60 = vmax.f32 %v1004_v50, 0.0  ;;  %v1052_v61 = vmax.f32 %v1020_v52, 0.0  ;;  %v966_v62 = vmul.f32 %v1641_v53, %v2202_v51  ;;  %v982_v63 = vmul.f32 %v1689_v54, %v2202_v51 }
 0x150   : > { %v1643_v0 = vpop.f32.mrf.mxu0  ;;  %v1691_v1 = vpop.f32.mrf.mxu1 }
 0x151   : > { %v1521_v2 = vpack.c.bf16 %v1036_v60, %v1035_v57  ;;  %v1561_v3 = vpack.c.bf16 %v1052_v61, %v1051_v58  ;;  %v1644_v4 = vadd.f32 %v1643_v0, %v1642_v55  ;;  %v1692_v5 = vadd.f32 %v1691_v1, %v1690_v56 }
 0x152   : > { %v1645_v6 = vpop.f32.mrf.mxu0  ;;  %v1693_v7 = vpop.f32.mrf.mxu1  ;;  %v1005_v8 = vadd.f32 %v2209_v59, %v966_v62  ;;  %v1021_v9 = vadd.f32 %v2209_v59, %v982_v63 }
 0x153   : > { %1581 = vst [vmem:[%s2220_s9 + $0x20] sm:$0xff] %v1521_v2   ;;  %1589 = vst [vmem:[%s2220_s9 + $0x60] sm:$0xff] %v1561_v3   ;;  %v967_v10 = vmul.f32 %v1644_v4, %v2202_v51  ;;  %v983_v11 = vmul.f32 %v1692_v5, %v2202_v51 }
 0x154   : > { %v1646_v12 = vpop.f32.mrf.mxu0  ;;  %v1694_v13 = vpop.f32.mrf.mxu1  ;;  %v1037_v22 = vmax.f32 %v1005_v8, 0.0  ;;  %v1053_v23 = vmax.f32 %v1021_v9, 0.0 }
 0x155   : > { %v1647_v14 = vadd.f32 %v1646_v12, %v1645_v6  ;;  %v1695_v15 = vadd.f32 %v1694_v13, %v1693_v7  ;;  %v1006_v16 = vadd.f32 %v2209_v59, %v967_v10  ;;  %v1022_v17 = vadd.f32 %v2209_v59, %v983_v11 }
 0x156   : > { %v1648_v18 = vpop.f32.mrf.mxu0  ;;  %v1696_v19 = vpop.f32.mrf.mxu1 }
 0x157   : > { %v968_v20 = vmul.f32 %v1647_v14, %v2202_v51  ;;  %v984_v21 = vmul.f32 %v1695_v15, %v2202_v51  ;;  %v1038_v24 = vmax.f32 %v1006_v16, 0.0  ;;  %v1054_v25 = vmax.f32 %v1022_v17, 0.0 }
 0x158   : > { %v1649_v26 = vpop.f32.mrf.mxu0  ;;  %v1697_v27 = vpop.f32.mrf.mxu1 }
 0x159   : > { %v1650_v28 = vadd.f32 %v1649_v26, %v1648_v18  ;;  %v1698_v29 = vadd.f32 %v1697_v27, %v1696_v19  ;;  %v1526_v30 = vpack.c.bf16 %v1038_v24, %v1037_v22  ;;  %v1566_v31 = vpack.c.bf16 %v1054_v25, %v1053_v23 }
 0x15a   : > { %v1651_v32 = vpop.f32.mrf.mxu0  ;;  %v1699_v33 = vpop.f32.mrf.mxu1  ;;  %v1007_v34 = vadd.f32 %v2209_v59, %v968_v20  ;;  %v1023_v35 = vadd.f32 %v2209_v59, %v984_v21 }
 0x15b   : > { %v969_v36 = vmul.f32 %v1650_v28, %v2202_v51  ;;  %v985_v37 = vmul.f32 %v1698_v29, %v2202_v51  ;;  %1582 = vst [vmem:[%s2220_s9 + $0x28] sm:$0xff] %v1526_v30   ;;  %1590 = vst [vmem:[%s2220_s9 + $0x68] sm:$0xff] %v1566_v31  }
 0x15c   : > { %v1652_v38 = vpop.f32.mrf.mxu0  ;;  %v1700_v39 = vpop.f32.mrf.mxu1  ;;  %v1039_v46 = vmax.f32 %v1007_v34, 0.0  ;;  %v1055_v47 = vmax.f32 %v1023_v35, 0.0 }
 0x15d   : > { %v1008_v40 = vadd.f32 %v2209_v59, %v969_v36  ;;  %v1024_v41 = vadd.f32 %v2209_v59, %v985_v37  ;;  %v1653_v42 = vadd.f32 %v1652_v38, %v1651_v32  ;;  %v1701_v43 = vadd.f32 %v1700_v39, %v1699_v33 }
 0x15e   : > { %v1654_v44 = vpop.f32.mrf.mxu0  ;;  %v1702_v45 = vpop.f32.mrf.mxu1 }
 0x15f   : > { %v1040_v48 = vmax.f32 %v1008_v40, 0.0  ;;  %v1056_v49 = vmax.f32 %v1024_v41, 0.0  ;;  %v970_v50 = vmul.f32 %v1653_v42, %v2202_v51  ;;  %v986_v52 = vmul.f32 %v1701_v43, %v2202_v51 }
 0x160   : > { %v1655_v53 = vpop.f32.mrf.mxu0  ;;  %v1703_v54 = vpop.f32.mrf.mxu1 }
 0x161   : > { %v1531_v55 = vpack.c.bf16 %v1040_v48, %v1039_v46  ;;  %v1571_v56 = vpack.c.bf16 %v1056_v49, %v1055_v47  ;;  %v1656_v57 = vadd.f32 %v1655_v53, %v1654_v44  ;;  %v1704_v58 = vadd.f32 %v1703_v54, %v1702_v45 }
 0x162   : > { %v1009_v60 = vadd.f32 %v2209_v59, %v970_v50  ;;  %v1025_v61 = vadd.f32 %v2209_v59, %v986_v52 }
 0x163   : > { %1583 = vst [vmem:[%s2220_s9 + $0x30] sm:$0xff] %v1531_v55   ;;  %1591 = vst [vmem:[%s2220_s9 + $0x70] sm:$0xff] %v1571_v56   ;;  %v971_v62 = vmul.f32 %v1656_v57, %v2202_v51  ;;  %v987_v63 = vmul.f32 %v1704_v58, %v2202_v51 }
 0x164   : > { %v1041_v2 = vmax.f32 %v1009_v60, 0.0  ;;  %v1057_v3 = vmax.f32 %v1025_v61, 0.0 }
 0x165   : > { %v1010_v0 = vadd.f32 %v2209_v59, %v971_v62  ;;  %v1026_v1 = vadd.f32 %v2209_v59, %v987_v63 }
 0x167   : > { %v1042_v4 = vmax.f32 %v1010_v0, 0.0  ;;  %v1058_v5 = vmax.f32 %v1026_v1, 0.0 }
 0x169   : > { %v1536_v51 = vpack.c.bf16 %v1042_v4, %v1041_v2  ;;  %v1576_v6 = vpack.c.bf16 %v1058_v5, %v1057_v3 }
 0x16b   : > { %1584 = vst [vmem:[%s2220_s9 + $0x38] sm:$0xff] %v1536_v51   ;;  %1592 = vst [vmem:[%s2220_s9 + $0x78] sm:$0xff] %v1576_v6  }
 0x16c   : > { %1931 = shalt.err (!%p1928_p5)
}
 0x16d   : > { %s1932_s6 = scalar_lea.hbm %s2295_s29, 2048  ;;  %s1936_s27 = scalar_lea.hbm %s2351_s4, 4096 }
 0x16e   : > { %p1933_p7 = scmp.ne.s32.totalorder %s2295_s29, %s1932_s6  ;;  %p1937_p9 = scmp.lt.s32.totalorder %s2295_s29, %s2351_s4 }
 0x16f   : > { %p1938_p11 = scmp.lt.s32.totalorder %s1936_s27, %s1932_s6 }
 0x170   : > { %p1934_p6 = pnand %p1933_p7, %p2125_p13 }
 0x171   : > { %p1939_p12 = por %p1938_p11, %p1937_p9 }
 0x172   : > { %p1935_p4 = pneg %p1934_p6 }
 0x174   : > { %p1940_p1 = pnand %p1939_p12, %p1935_p4 }
 0x176   : > { %1943 = shalt.err (!%p1940_p1)
}
 0x177   : > { %s2011_s9 = smov 64   ;;  %s2012_s24 = smov 4  }
 0x178   : > { %1727 = dma.vmem_to_hbm [thread:$0]  (%p2125_p13), %s2297_s10, 2048, %s2295_s29, %s1220_s18, %s2011_s9, %s2011_s9, %s2012_s24  }
 0x179 PF: > { %s1249_s14 = sand.u32 1, %s1982_s15   ;;  %p2365_p8 = scmp.ne.s32.totalorder %s2357_s26, 0 }
 0x17a   : > { %p2366_p10 = scmp.ge.s32.totalorder %s2002_s20, 2  ;;  %s1250_s11 = scalar_lea.sflag [#allocation5], %s1249_s14 }
 0x17c   : > { %p1738_p0 = pnand %p2366_p10, %p2365_p8 }
 0x17e   : > { %p1739_p2 = pneg %p1738_p0 }
 0x180   : > { %1977 = dma.done.wait (%p1739_p2), %s1250_s11, 2048  }
 0x181   : > { %1979 = vsyncadd (%p1739_p2), %s1250_s11, 4294965248  ;;  %s21_s20 = sadd.s32 1, %s2002_s20   ;;  %s2367_s15 = smov %s1986_s16 }
 0x182   : > { %p18_p3 = scmp.ge.s32.totalorder %s21_s20, 4   ;;  %s2368_s16 = smov %s1990_s17 }
 0x183   : > { %s2369_s17 = smov %s2134_s28  ;;  %s2370_s18 = smov %s1998_s19 }
 0x184   : > { %s2371_s19 = smov %s2373_s5  ;;  %20 = sbr.rel (!%p18_p3) target bundleno = 9 (0x9), region = 100 }
 0x189   :  { %1255 = vsyncpa [#allocation4], 1 }
 0x18a   :  { %1257 = vsyncpa [#allocation4 + $0x1], 1 }
 0x18b   :  { %1258 = vsyncpa [#allocation7], 1 }
 0x18c   :  { %1259 = vsyncpa [#allocation5], 1 }
 0x18d   :  { %1261 = vsyncpa [#allocation5 + $0x1], 1 }

</bundles_post_ra>
